<compile_context>
chip_gen: v7x
topology: tpu7x:2x2x1
jax: 0.10.0
libtpu: 0.0.40
codegen_flags: <defaults>
</compile_context>

<pallas_src>
import functools

import jax
import jax.numpy as jnp
from jax.experimental import pallas as pl
from jax.experimental.pallas import tpu as pltpu


def _positive_mass_kernel(sqrt_mass_ref, out_ref, *, min_mass_val: float):
    # Both refs live in SMEM: pure scalar-core work (2 scalar slots/bundle),
    # no vector load/store, no lane masking, no DMA pipeline.
    s = sqrt_mass_ref[0].astype(jnp.float32)   # scalar cast is free on the scalar ALU
    out_ref[0] = s * s + min_mass_val          # square + additive floor (baked const)


def positive_mass_value(sqrt_mass: jax.Array, min_mass_val: float = 0.01) -> jax.Array:
    """sqrt_mass: shape (1,) float array -> returns shape (1,) float32.

    No wrapper-side reshape/cast ops: shape is validated statically and any
    dtype cast happens on the scalar inside the kernel.
    """
    if sqrt_mass.shape != (1,):
        raise ValueError(f"sqrt_mass must have shape (1,), got {sqrt_mass.shape}")
    if not jnp.issubdtype(sqrt_mass.dtype, jnp.floating):
        raise ValueError(f"sqrt_mass must be a float array, got {sqrt_mass.dtype}")

    kernel = functools.partial(_positive_mass_kernel, min_mass_val=float(min_mass_val))

    return pl.pallas_call(
        kernel,
        out_shape=jax.ShapeDtypeStruct((1,), jnp.float32),
        in_specs=[pl.BlockSpec(memory_space=pltpu.MemorySpace.SMEM)],
        out_specs=pl.BlockSpec(memory_space=pltpu.MemorySpace.SMEM),
    )(sqrt_mass)


if __name__ == "__main__":
    key = jax.random.PRNGKey(0)

    # Deterministic parameter init mirroring the PyTorch __init__:
    #   init_param_value = sqrt(rand(1) ** 2) == rand(1)  (uniform in [0, 1))
    sqrt_mass = jax.random.uniform(key, (1,), dtype=jnp.float32)

    result = positive_mass_value(sqrt_mass)
    jax.block_until_ready(result)

    # Reference check in plain JAX.
    ref = sqrt_mass * sqrt_mass + jnp.float32(0.01)
    assert result.shape == (1,)
    assert result.dtype == jnp.float32
    assert jnp.allclose(result, ref, rtol=1e-6, atol=1e-6)

    print("KERNEL_OK")
</pallas_src>

<mosaic_0001>
module attributes {stable_mosaic.version = 11 : i64} {
  func.func @_positive_mass_kernel(%arg0: memref<1xf32, #tpu.memory_space<smem>>, %arg1: memref<1xf32, #tpu.memory_space<smem>>) attributes {dimension_semantics = [], scalar_prefetch = 0 : i64, scratch_operands = 0 : i64, tpu.core_type = #tpu.core_type<tc>} {
    %c0 = arith.constant 0 : index
    %0 = memref.load %arg0[%c0] : memref<1xf32, #tpu.memory_space<smem>>
    %1 = arith.mulf %0, %0 : f32
    %cst = arith.constant 0.00999999977 : f32
    %2 = arith.addf %1, %cst : f32
    %c0_0 = arith.constant 0 : index
    %3 = memref.load %arg1[%c0_0] : memref<1xf32, #tpu.memory_space<smem>>
    memref.store %2, %arg1[%c0_0] : memref<1xf32, #tpu.memory_space<smem>>
    return
  }
}

</mosaic_0001>

<bundles_post_ra>
// kernel: tpu_custom_call.1
= control target key start
LH: loop header
LB: loop body
LE: loop exit
PB: predicated region body
PF: predicated region fallthrough
CT: control target
= control target key end

     0   :  { %7 = vsyncpa [#allocation4], 0  ;;  %s68_s0 = inlined_call_operand.<no memory space> [shape: f32[1], index: 0, kind: input, shape index: {}]   ;;  %s69_s1 = inlined_call_operand.hbm [shape: f32[1], index: 1, kind: output, shape index: {}]  }
   0x1   :  { %s11_s8 = smul.f32 %s68_s0, %s68_s0  ;;  %s29_s12 = scalar_lea.hbm %s69_s1, 16 }
   0x2   :  { %p30_p0 = scmp.ne.s32.totalorder %s69_s1, %s29_s12  ;;  %p33_p1 = scmp.lt.u32.totalorder %s29_s12, %s69_s1 }
   0x3   :  { %s12_s9 = sadd.f32 0.01, %s11_s8 }
   0x4   :  { %p35_p2 = pnand %p33_p1, %p30_p0 }
   0x5   :  { %14 = sst [smem:[#allocation3]] %s12_s9 }
   0x6   :  { %38 = shalt.err (!%p35_p2)
}
   0x7   :  { %s41_s17 = smov [#allocation3]  }
   0x8   :  { %22 = dma.smem_to_hbm %s41_s17, 16, %s69_s1, [#allocation4]  }
   0x9   :  { %39 = dma.done.wait [#allocation4], 16  }
   0xa   :  { %40 = vsyncadd [#allocation4], 4294967280 }
   0xb   :  { %26 = sfence }
   0xc   :  { %27 = vsyncpa [#allocation4], 1 }

</bundles_post_ra>
